<compile_context>
chip_gen: v6e
topology: v6e:2x2x1
jax: 0.10.0
libtpu: 0.0.40
codegen_flags: <defaults>
</compile_context>

<pallas_src>
import jax
import jax.numpy as jnp
from jax.experimental import pallas as pl
from jax.experimental.pallas import tpu as pltpu

_LANE = 128


def _parallel_encoder_concat_kernel(a1_ref, a2_ref, w_ref, b_ref, o_ref):
    # a1_ref, a2_ref: (B, h)      float32 activations.
    # w_ref         : (2h, C_pad) bfloat16 pre-transposed weight.
    # b_ref         : (1, C_pad)  float32 bias.
    # o_ref         : (B, C_pad)  float32 output, lane-dense (unmasked vst).
    #
    # Fuse CONCAT into a single K = 2h MXU push: in-kernel concat along the
    # lane axis is a cheap shift/select, and one K=64 bf16 dot replaces two
    # tiny K=32 pushes (per-push fixed MXU latency dominates at M=8).
    x = jnp.concatenate([a1_ref[...], a2_ref[...]], axis=1).astype(jnp.bfloat16)
    acc = jnp.dot(x, w_ref[...], preferred_element_type=jnp.float32)
    acc = acc + b_ref[...]                       # (1, C_pad) broadcast over batch
    o_ref[...] = jnp.tanh(acc).astype(o_ref.dtype)   # f32 epilogue (v5e-safe)


def prepare_params(weight, bias):
    """One-time (init-time) parameter preparation — NOT in the per-call path.

    weight: (C, 2h) float32, same layout as torch nn.Linear.weight
    bias:   (C,)    float32
    Returns:
      w_pad: (2h, C_pad) bfloat16  pre-transposed, output dim zero-padded to a
                                   multiple of 128 lanes, bf16 for the MXU's
                                   native path (f32 accumulation in-kernel)
      b_pad: (1, C_pad)  float32
    """
    C, two_h = weight.shape
    c_pad = ((C + _LANE - 1) // _LANE) * _LANE
    w_t = jnp.asarray(weight, jnp.float32).T                      # (2h, C)
    w_pad = jnp.zeros((two_h, c_pad), jnp.float32).at[:, :C].set(w_t)
    w_pad = w_pad.astype(jnp.bfloat16)
    b_pad = jnp.zeros((1, c_pad), jnp.float32).at[0, :C].set(
        jnp.asarray(bias, jnp.float32))
    return w_pad, b_pad


def parallel_model_forward(argument1, argument2, w_pad, b_pad, *, out_features):
    """ParallelModel.forward (ENCODER + CONCAT).

    argument1, argument2: (B, h) float32
    w_pad: (2h, C_pad) bfloat16  (from prepare_params)
    b_pad: (1, C_pad)  float32   (from prepare_params)
    returns logit: (B, out_features) float32
    """
    B, h = argument1.shape
    two_h, c_pad = w_pad.shape
    assert two_h == 2 * h
    assert b_pad.shape == (1, c_pad)

    vmem = pl.BlockSpec(memory_space=pltpu.MemorySpace.VMEM)

    flops = 2 * B * two_h * c_pad
    bytes_accessed = (4 * (argument1.size + argument2.size + b_pad.size + B * c_pad)
                      + 2 * w_pad.size)

    out = pl.pallas_call(
        _parallel_encoder_concat_kernel,
        out_shape=jax.ShapeDtypeStruct((B, c_pad), jnp.float32),
        in_specs=[vmem, vmem, vmem, vmem],
        out_specs=vmem,
        cost_estimate=pl.CostEstimate(
            flops=flops,
            transcendentals=B * c_pad,
            bytes_accessed=bytes_accessed),
    )(argument1, argument2, w_pad, b_pad)

    # TODO(synk): consumers that accept the lane-dense padded (B, C_pad) slab
    # should take `out` directly and skip this tiny XLA slice op.
    return out[:, :out_features]


if __name__ == "__main__":
    # Small shapes consistent with the module: B=8, input_size=32, output_size=16.
    B, input_size, output_size = 8, 32, 16

    key = jax.random.PRNGKey(0)
    k1, k2, kw, kb = jax.random.split(key, 4)

    argument1 = jax.random.normal(k1, (B, input_size), dtype=jnp.float32)
    argument2 = jax.random.normal(k2, (B, input_size), dtype=jnp.float32)

    # Deterministic "parameters" for h2o = nn.Linear(2*input_size, output_size).
    weight = 0.05 * jax.random.normal(kw, (output_size, 2 * input_size), dtype=jnp.float32)
    bias = 0.05 * jax.random.normal(kb, (output_size,), dtype=jnp.float32)

    # One-time init-time layout prep (cached; never re-run per forward call).
    w_pad, b_pad = prepare_params(weight, bias)

    fwd = jax.jit(parallel_model_forward, static_argnames=("out_features",))
    logit = fwd(argument1, argument2, w_pad, b_pad, out_features=output_size)
    jax.block_until_ready(logit)

    # Reference check in plain JAX (same math as the torch forward, f32 weights).
    ref = jnp.tanh(jnp.concatenate([argument1, argument2], axis=1) @ weight.T + bias)
    assert logit.shape == (B, output_size)
    # Tolerance loosened for the bf16 weight/activation path (f32 accumulation).
    assert jnp.allclose(logit, ref, atol=2e-2, rtol=2e-2)

    print("KERNEL_OK")
</pallas_src>

<mosaic_0001>
module attributes {stable_mosaic.version = 11 : i64} {
  func.func @_parallel_encoder_concat_kernel(%arg0: memref<8x32xf32, #tpu.memory_space<vmem>>, %arg1: memref<8x32xf32, #tpu.memory_space<vmem>>, %arg2: memref<64x128xbf16, #tpu.memory_space<vmem>>, %arg3: memref<1x128xf32, #tpu.memory_space<vmem>>, %arg4: memref<8x128xf32, #tpu.memory_space<vmem>>) attributes {dimension_semantics = [], scalar_prefetch = 0 : i64, scratch_operands = 0 : i64, tpu.core_type = #tpu.core_type<tc>} {
    %c0 = arith.constant 0 : index
    %c0_0 = arith.constant 0 : index
    %0 = vector.load %arg0[%c0, %c0_0] : memref<8x32xf32, #tpu.memory_space<vmem>>, vector<8x32xf32>
    %c0_1 = arith.constant 0 : index
    %c0_2 = arith.constant 0 : index
    %1 = vector.load %arg1[%c0_1, %c0_2] : memref<8x32xf32, #tpu.memory_space<vmem>>, vector<8x32xf32>
    %2 = tpu.concatenate %0, %1 in 1 : vector<8x32xf32>, vector<8x32xf32> -> vector<8x64xf32>
    %3 = arith.truncf %2 : vector<8x64xf32> to vector<8x64xbf16>
    %c0_3 = arith.constant 0 : index
    %c0_4 = arith.constant 0 : index
    %4 = vector.load %arg2[%c0_3, %c0_4] : memref<64x128xbf16, #tpu.memory_space<vmem>>, vector<64x128xbf16>
    %cst = arith.constant dense<0.000000e+00> : vector<8x128xf32>
    %5 = tpu.matmul %3, %4, %cst {dimension_numbers = #tpu.dot_dimension_numbers<[1], [0], [0], [1], [0, 0, 1, 1], [], []>} : vector<8x64xbf16>, vector<64x128xbf16>, vector<8x128xf32> -> vector<8x128xf32>
    %c0_5 = arith.constant 0 : index
    %c0_6 = arith.constant 0 : index
    %6 = vector.load %arg3[%c0_5, %c0_6] : memref<1x128xf32, #tpu.memory_space<vmem>>, vector<1x128xf32>
    %7 = vector.broadcast %6 : vector<1x128xf32> to vector<8x128xf32>
    %8 = arith.addf %5, %7 : vector<8x128xf32>
    %9 = math.tanh %8 : vector<8x128xf32>
    %c0_7 = arith.constant 0 : index
    %c0_8 = arith.constant 0 : index
    %10 = vector.load %arg4[%c0_7, %c0_8] : memref<8x128xf32, #tpu.memory_space<vmem>>, vector<8x128xf32>
    tpu.vector_store %arg4[%c0_7, %c0_8], %9 {strides = array<i32>} : memref<8x128xf32, #tpu.memory_space<vmem>>, vector<8x128xf32>,
    return
  }
}

</mosaic_0001>

<bundles_post_ra>
// kernel: parallel_model_forward.1
= control target key start
LH: loop header
LB: loop body
LE: loop exit
PB: predicated region body
PF: predicated region fallthrough
CT: control target
= control target key end

     0   :  { %9 = vsyncpa [#allocation3], 0  ;;  %s339_s0 = inlined_call_operand.hbm [shape: f32[8,32], index: 0, kind: input, shape index: {}]   ;;  %s340_s1 = inlined_call_operand.hbm [shape: f32[8,32], index: 1, kind: input, shape index: {}]   ;;  %s341_s2 = inlined_call_operand.hbm [shape: bf16[64,128], index: 2, kind: input, shape index: {}]   ;;  %s342_s3 = inlined_call_operand.vmem [shape: f32[1,128], index: 3, kind: input, shape index: {}]   ;;  %s343_s4 = inlined_call_operand.hbm [shape: f32[8,128], index: 4, kind: output, shape index: {}]  }
   0x1   :  { %10 = vsyncpa [#allocation6], 0 }
   0x2   :  { %11 = vsyncpa [#allocation4], 0  ;;  %s290_s15 = smov [#allocation5]   ;;  %s291_s17 = smov [#allocation2]  }
   0x3   :  { %s28_s16 = sshll.u32 %s290_s15, 4  ;;  %s18_s18 = sshll.u32 %s291_s17, 4  ;;  %s29_s16 = int_to_ptr.vmem [resolvable:$true] %s28_s16  ;;  %s19_s18 = int_to_ptr.vmem [resolvable:$true] %s18_s18 }
   0x4   :  { %s212_s19 = scalar_lea.vmem %s29_s16, 128  ;;  %p217_p1 = scmp.lt.s32.totalorder %s29_s16, %s29_s16 }
   0x5   :  { %p213_p0 = scmp.ne.s32.totalorder %s29_s16, %s212_s19  ;;  %p218_p2 = scmp.lt.s32.totalorder %s212_s19, %s212_s19 }
   0x7   :  { %p219_p3 = por %p218_p2, %p217_p1 }
   0x9   :  { %p220_p4 = pnand %p219_p3, %p213_p0 }
   0xb   :  { %223 = shalt.err (!%p220_p4)
}
   0xc   :  { %31 = dma.hbm_to_vmem [thread:$0]  %s340_s1, 128, %s29_s16, [#allocation6]  }
   0xd   :  { %s232_s22 = scalar_lea.vmem %s19_s18, 128  ;;  %p237_p6 = scmp.lt.s32.totalorder %s19_s18, %s19_s18 }
   0xe   :  { %p233_p5 = scmp.ne.s32.totalorder %s19_s18, %s232_s22  ;;  %p238_p7 = scmp.lt.s32.totalorder %s232_s22, %s232_s22 }
  0x10   :  { %p239_p8 = por %p238_p7, %p237_p6 }
  0x12   :  { %p240_p9 = pnand %p239_p8, %p233_p5 }
  0x14   :  { %243 = shalt.err (!%p240_p9)
}
  0x15   :  { %21 = dma.hbm_to_vmem [thread:$0]  %s339_s0, 128, %s19_s18, [#allocation3]  }
  0x16   :  { %s292_s25 = smov [#allocation7]  }
  0x17   :  { %s37_s26 = sshll.u32 %s292_s25, 4  ;;  %s38_s26 = int_to_ptr.vmem [resolvable:$true] %s37_s26 }
  0x18   :  { %s252_s27 = scalar_lea.vmem %s38_s26, 512  ;;  %p257_p11 = scmp.lt.s32.totalorder %s38_s26, %s38_s26 }
  0x19   :  { %p253_p10 = scmp.ne.s32.totalorder %s38_s26, %s252_s27  ;;  %p258_p12 = scmp.lt.s32.totalorder %s252_s27, %s252_s27 }
  0x1b   :  { %p259_p13 = por %p258_p12, %p257_p11 }
  0x1d   :  { %p260_p0 = pnand %p259_p13, %p253_p10 }
  0x1f   :  { %263 = shalt.err (!%p260_p0)
}
  0x20   :  { %s293_s1 = smov 64   ;;  %s294_s28 = smov 4  }
  0x21   :  { %43 = dma.hbm_to_vmem [thread:$0]  %s341_s2, 512, %s38_s26, [#allocation6], %s293_s1, %s293_s1, %s294_s28  }
  0x22   :  { %284 = dma.done.wait [#allocation3], 128  }
  0x23   :  { %285 = vsyncadd [#allocation3], 4294967168 }
  0x24   :  { %286 = dma.done.wait [#allocation6], 640  }
  0x25   :  { %287 = vsyncadd [#allocation6], 4294966656  ;;  %v295_v0 = vmov 0.0   ;;  %vm296_vm0 = vmmov 0   ;;  %v57_v1 = vld [vmem:[#allocation5] sm:$0xff]  ;;  %s297_s0 = smov 32  }
  0x26   :  { %177 = vmatprep.subr.bf16.mxu0 %v295_v0  ;;  %185 = vmatprep.mubr.msk.bf16.mxu0 %vm296_vm0, %v295_v0  ;;  %v198_v2 = vld [vmem:[#allocation7 + $0x18] sm:$0xff]   ;;  %v199_v3 = vld [vmem:[#allocation7 + $0x10] sm:$0xff]   ;;  %v200_v4 = vld [vmem:[#allocation7 + $0x8] sm:$0xff]   ;;  %vm62_vm1 = vcmask 261120   ;;  %vm104_vm2 = vcmask 523264   ;;  %s298_s6 = smov [#allocation8]  }
  0x27   :  { %59 = vrot.lane.b32.xlu0 %v57_v1, %s297_s0  ;;  %178 = vmatpush3.bf16.msra.mxu0 %v198_v2  ;;  %v201_v5 = vld [vmem:[#allocation7] sm:$0xff]   ;;  %v56_v6 = vld [vmem:[#allocation2] sm:$0xff]  ;;  %s156_s7 = sshll.u32 %s298_s6, 4  ;;  %s157_s7 = int_to_ptr.vmem [resolvable:$true] %s156_s7 }
  0x28   :  { %179 = vmatprep.subr.bf16.mxu0 %v295_v0  ;;  %v166_v10 = vld [vmem:[%s342_s3] ss:$0 sm:$0xff]  ;;  %s264_s8 = scalar_lea.vmem %s157_s7, 128  ;;  %p269_p2 = scmp.lt.s32.totalorder %s157_s7, %s157_s7 }
  0x29   :  { %p265_p1 = scmp.ne.s32.totalorder %s157_s7, %s264_s8  ;;  %p270_p3 = scmp.lt.s32.totalorder %s264_s8, %s264_s8 }
  0x2b   :  { %180 = vmatpush3.bf16.msra.mxu0 %v199_v3  ;;  %p271_p4 = por %p270_p3, %p269_p2 }
  0x2c   :  { %181 = vmatprep.subr.bf16.mxu0 %v295_v0 }
  0x2d   :  { %p272_p5 = pnand %p271_p4, %p265_p1 }
  0x2f   :  { %182 = vmatpush3.bf16.msra.mxu0 %v200_v4 }
  0x30   :  { %183 = vmatprep.subr.bf16.mxu0 %v295_v0 }
  0x33   :  { %184 = vmatpush3.bf16.msra.mxu0 %v201_v5 }
  0x99   :  { %v60_v7 = vpop.permute.xlu0 %59 }
  0x9a   :  { %v63_v8 = vsel %vm62_vm1, %v56_v6, %v60_v7 }
  0x9b   :  { %v64_v9 = vpack.c.bf16 %v63_v8, %v63_v8 }
  0x9d   :  { %186 = vmatmul.mubr.msk.bf16.vlgmr.msra.gmra.mxu0 %vm104_vm2, %v64_v9 }
 0x15d   :  { %v142_v11 = vpop.f32.mrf.mxu0 }
 0x15e   :  { %v143_v12 = vadd.f32 %v166_v10, %v142_v11 }
 0x15f   :  { %v187_v13 = vpop.f32.mrf.mxu0 }
 0x160   :  { %202 = vtanh.f32 %v143_v12 }
 0x161   :  { %v145_v14 = vpop.f32.mrf.mxu0 }
 0x163   :  { %v188_v15 = vpop.f32.mrf.mxu0 }
 0x16d   :  { %v203_v16 = vpop.eup %202 }
 0x16e   :  { %149 = vst [vmem:[#allocation8] sm:$0xff] %v203_v16 }
 0x16f   :  { %275 = shalt.err (!%p272_p5)
}
 0x170   :  { %159 = dma.vmem_to_hbm [thread:$0]  %s157_s7, 128, %s343_s4, [#allocation4]  }
 0x171   :  { %288 = dma.done.wait [#allocation4], 128  }
 0x172   :  { %289 = vsyncadd [#allocation4], 4294967168 }
 0x173   :  { %163 = vsyncpa [#allocation3], 1 }
 0x174   :  { %164 = vsyncpa [#allocation6], 1 }
 0x175   :  { %165 = vsyncpa [#allocation4], 1 }

</bundles_post_ra>
